<compile_context>
chip_gen: v7x
topology: tpu7x:2x2x1
jax: 0.10.0
libtpu: 0.0.40
codegen_flags: <defaults>
</compile_context>

<pallas_src>
import jax
import jax.numpy as jnp
from jax.experimental import pallas as pl
from jax.experimental.pallas import tpu as pltpu


def from_rgb_kernel(x_ref, w_ref, b_ref, o_ref):
    # x_ref: (1, C, t_hw)  w_ref: (O, C)  b_ref: (O, 1)  o_ref: (1, O, t_hw)
    y = jnp.dot(w_ref[...], x_ref[0], preferred_element_type=jnp.float32)
    y = y + b_ref[...]                      # (O, 1) broadcasts over lanes
    y = jnp.where(y >= 0, y, 0.2 * y)       # leaky_relu, slope 0.2, in f32
    o_ref[0] = y.astype(o_ref.dtype)


def _pick_hw_tile(HW, C, O, itemsize, vmem_budget_bytes):
    """Largest lane tile whose double-buffered in+out footprint fits the budget.

    Per-step VMEM ~ 2 * (C + O) * t_hw * itemsize  (input tile + output tile,
    each double-buffered); weight/bias are tiny and resident.
    """
    max_lanes = vmem_budget_bytes // (2 * (C + O) * itemsize)
    if HW <= max_lanes:
        return HW                       # full-dim block is always legal
    t = (int(max_lanes) // 128) * 128   # lane-dense multiple of 128
    return max(t, 128)


def from_rgb_forward(x_nchw, weight_oc, bias_o, *, vmem_budget_bytes=10 * 1024 * 1024):
    """FromRGB forward: 1x1 conv (stride 1, pad 0) + leaky_relu(0.2).

    x_nchw:    (N, C, H, W)
    weight_oc: (O, C)   -- squeezed from the PyTorch (O, C, 1, 1) conv weight
    bias_o:    (O,)
    returns    (N, O, H, W)
    """
    N, C, H, W = x_nchw.shape
    O = weight_oc.shape[0]
    HW = H * W

    # Free reshapes: NCHW is row-major so (N, C, H*W) is just a view.
    x3d = x_nchw.reshape(N, C, HW)
    b2d = bias_o.reshape(O, 1)

    itemsize = jnp.dtype(x_nchw.dtype).itemsize
    t_hw = _pick_hw_tile(HW, C, O, itemsize, vmem_budget_bytes)
    grid = (N, pl.cdiv(HW, t_hw))

    y3d = pl.pallas_call(
        from_rgb_kernel,
        out_shape=jax.ShapeDtypeStruct((N, O, HW), x_nchw.dtype),
        grid_spec=pltpu.PrefetchScalarGridSpec(
            num_scalar_prefetch=0,
            grid=grid,
            in_specs=[
                pl.BlockSpec((1, C, t_hw), lambda n, j: (n, 0, j)),
                pl.BlockSpec((O, C), lambda n, j: (0, 0)),   # resident weight
                pl.BlockSpec((O, 1), lambda n, j: (0, 0)),   # resident bias
            ],
            out_specs=pl.BlockSpec((1, O, t_hw), lambda n, j: (n, 0, j)),
        ),
        compiler_params=pltpu.CompilerParams(
            dimension_semantics=("parallel", "parallel")),
    )(x3d, weight_oc, b2d)

    # Free reshape back to NCHW.
    return y3d.reshape(N, O, H, W)


if __name__ == "__main__":
    # Small shapes implied by the module: RGB-ish input, 1x1 conv to `outputs`.
    N, C, H, W = 2, 4, 16, 16
    OUT = 32

    key = jax.random.PRNGKey(0)
    kx, kw, kb = jax.random.split(key, 3)

    x = jax.random.normal(kx, (N, C, H, W), dtype=jnp.float32)
    # Deterministic init of conv params (shapes from nn.Conv2d(C, OUT, 1, 1, 0)).
    weight = jax.random.normal(kw, (OUT, C), dtype=jnp.float32) * 0.1  # (O,C,1,1) squeezed
    bias = jax.random.normal(kb, (OUT,), dtype=jnp.float32) * 0.1
    # TODO(synk): the original `ln.Conv2d` (equalized-lr conv) applies a runtime
    # weight scale; with deterministic in-script init it is folded into `weight`.

    out = from_rgb_forward(x, weight, bias)
    jax.block_until_ready(out)

    # Reference check: 1x1 conv == per-pixel matmul, then leaky_relu(0.2).
    ref = jnp.einsum("nchw,oc->nohw", x, weight) + bias[None, :, None, None]
    ref = jnp.where(ref >= 0, ref, 0.2 * ref)
    assert out.shape == (N, OUT, H, W)
    assert jnp.allclose(out, ref, atol=1e-5, rtol=1e-5)

    print("KERNEL_OK")
</pallas_src>

<mosaic_0001>
module attributes {stable_mosaic.version = 11 : i64} {
  func.func @from_rgb_kernel(%arg0: i32, %arg1: i32, %arg2: memref<1x4x256xf32, #tpu.memory_space<vmem>>, %arg3: memref<32x4xf32, #tpu.memory_space<vmem>>, %arg4: memref<32x1xf32, #tpu.memory_space<vmem>>, %arg5: memref<1x32x256xf32, #tpu.memory_space<vmem>>) attributes {dimension_semantics = [#tpu.dimension_semantics<parallel>, #tpu.dimension_semantics<parallel>], iteration_bounds = array<i64: 2, 1>, scalar_prefetch = 0 : i64, scratch_operands = 0 : i64, tpu.core_type = #tpu.core_type<tc>, window_params = [{transform_indices = @transform_0, window_bounds = array<i64: 1, 4, 256>}, {pipeline_mode = #tpu.pipeline_mode<synchronous>, transform_indices = @transform_1, window_bounds = array<i64: 32, 4>}, {pipeline_mode = #tpu.pipeline_mode<synchronous>, transform_indices = @transform_2, window_bounds = array<i64: 32, 1>}, {transform_indices = @transform_3, window_bounds = array<i64: 1, 32, 256>}]} {
    %c0 = arith.constant 0 : index
    %c0_0 = arith.constant 0 : index
    %0 = vector.load %arg3[%c0, %c0_0] : memref<32x4xf32, #tpu.memory_space<vmem>>, vector<32x4xf32>
    %c0_1 = arith.constant 0 : index
    %c0_2 = arith.constant 0 : index
    %c0_3 = arith.constant 0 : index
    %1 = vector.load %arg2[%c0_1, %c0_2, %c0_3] : memref<1x4x256xf32, #tpu.memory_space<vmem>>, vector<1x4x256xf32>
    %2 = vector.shape_cast %1 : vector<1x4x256xf32> to vector<4x256xf32>
    %cst = arith.constant dense<0.000000e+00> : vector<32x256xf32>
    %3 = tpu.matmul %0, %2, %cst {dimension_numbers = #tpu.dot_dimension_numbers<[1], [0], [0], [1], [0, 0, 1, 1], [], []>} : vector<32x4xf32>, vector<4x256xf32>, vector<32x256xf32> -> vector<32x256xf32>
    %c0_4 = arith.constant 0 : index
    %c0_5 = arith.constant 0 : index
    %4 = vector.load %arg4[%c0_4, %c0_5] : memref<32x1xf32, #tpu.memory_space<vmem>>, vector<32x1xf32>
    %5 = vector.broadcast %4 : vector<32x1xf32> to vector<32x256xf32>
    %6 = arith.addf %3, %5 : vector<32x256xf32>
    %cst_6 = arith.constant 0.000000e+00 : f32
    %7 = vector.broadcast %cst_6 : f32 to vector<32x256xf32>
    %8 = arith.cmpf oge, %6, %7 : vector<32x256xf32>
    %cst_7 = arith.constant 2.000000e-01 : f32
    %9 = vector.broadcast %cst_7 : f32 to vector<32x256xf32>
    %10 = arith.mulf %9, %6 : vector<32x256xf32>
    %11 = arith.select %8, %6, %10 : vector<32x256xi1>, vector<32x256xf32>
    %c0_8 = arith.constant 0 : index
    %c0_9 = arith.constant 0 : index
    %c0_10 = arith.constant 0 : index
    %12 = vector.load %arg5[%c0_8, %c0_9, %c0_10] : memref<1x32x256xf32, #tpu.memory_space<vmem>>, vector<1x32x256xf32>
    %13 = vector.shape_cast %12 : vector<1x32x256xf32> to vector<32x256xf32>
    %14 = vector.shape_cast %11 : vector<32x256xf32> to vector<1x32x256xf32>
    tpu.vector_store %arg5[%c0_8, %c0_9, %c0_10], %14 {strides = array<i32>} : memref<1x32x256xf32, #tpu.memory_space<vmem>>, vector<1x32x256xf32>,
    return
  }
  func.func @transform_0(%arg0: i32, %arg1: i32) -> (i32, i32, i32) {
    %c0_i32 = arith.constant 0 : i32
    %c0_i32_0 = arith.constant 0 : i32
    return %arg0, %c0_i32, %arg1 : i32, i32, i32
  }
  func.func @transform_1(%arg0: i32, %arg1: i32) -> (i32, i32) {
    %c0_i32 = arith.constant 0 : i32
    %c0_i32_0 = arith.constant 0 : i32
    %c0_i32_1 = arith.constant 0 : i32
    return %c0_i32, %c0_i32_0 : i32, i32
  }
  func.func @transform_2(%arg0: i32, %arg1: i32) -> (i32, i32) {
    %c0_i32 = arith.constant 0 : i32
    %c0_i32_0 = arith.constant 0 : i32
    %c0_i32_1 = arith.constant 0 : i32
    return %c0_i32, %c0_i32_0 : i32, i32
  }
  func.func @transform_3(%arg0: i32, %arg1: i32) -> (i32, i32, i32) {
    %c0_i32 = arith.constant 0 : i32
    %c0_i32_0 = arith.constant 0 : i32
    return %arg0, %c0_i32, %arg1 : i32, i32, i32
  }
}

</mosaic_0001>

<bundles_post_ra>
// kernel: tpu_custom_call.1
= control target key start
LH: loop header
LB: loop body
LE: loop exit
PB: predicated region body
PF: predicated region fallthrough
CT: control target
= control target key end

     0   :  { %8 = vsyncpa [#allocation3], 0  ;;  %s809_s0 = inlined_call_operand.vmem [shape: f32[2,4,256], index: 0, kind: input, shape index: {}]   ;;  %s810_s1 = inlined_call_operand.vmem [shape: f32[32,4], index: 1, kind: input, shape index: {}]   ;;  %s811_s2 = inlined_call_operand.vmem [shape: f32[32,1], index: 2, kind: input, shape index: {}]   ;;  %s812_s3 = inlined_call_operand.hbm [shape: f32[2,32,256], index: 3, kind: output, shape index: {}]  }
   0x1   :  { %10 = vsyncpa [#allocation3 + $0x1], 0  ;;  %s655_s12 = smov 0   ;;  %s657_s13 = smov 0  }
   0x2   :  { %s659_s14 = smov 0   ;;  %s661_s15 = smov 0  }
   0x3   :  { %s663_s16 = smov 0   ;;  %s665_s17 = smov 0  }
   0x4 LB: > { %s465_s18 = sadd.s32 4294967295, %s628_s17   ;;  %s466_s19 = sadd.s32 4294967294, %s628_s17   ;;  %s628_s17 = sphi %s665_s17, %s16_s17   ;;  %s624_s16 = sphi %s663_s16, %s819_s16   ;;  %s620_s15 = sphi %s661_s15, %s818_s15   ;;  %s616_s14 = sphi %s659_s14, %s817_s14   ;;  %s612_s13 = sphi %s657_s13, %s816_s13   ;;  %s608_s12 = sphi %s655_s12, %s815_s12  }
   0x5   : > { %s28_s20 = sadd.s32 1, %s624_s16  ;;  %s107_s21 = sadd.s32 1, %s616_s14 }
   0x6   : > { %p30_p0 = scmp.ge.s32.totalorder %s28_s20, 2  ;;  %p117_p1 = scmp.ne.s32.totalorder %s616_s14, %s612_s13 }
   0x7   : > { %p118_p2 = scmp.eq.s32.totalorder %s465_s18, 1  ;;  %p123_p3 = scmp.ne.s32.totalorder %s612_s13, %s608_s12 }
   0x8   : > { %s821_s20 = smov (%p30_p0, %s28_s20), 0  ;;  %p124_p5 = scmp.eq.s32.totalorder %s466_s19, 1 }
   0x9   : > { %p695_p4 = por %p118_p2, %p117_p1  ;;  %s102_s23 = ssub.s32 %s624_s16, %s821_s20 }
   0xa   : > { %p469_p6 = scmp.ge.s32.totalorder %s628_s17, 1  ;;  %p105_p7 = scmp.eq.s32.totalorder %s102_s23, 0 }
   0xb   : > { %p702_p8 = por %p124_p5, %p123_p3  ;;  %p161_p9 = scmp.lt.s32.totalorder %s628_s17, 3 }
   0xc   : > { %s708_s25 = scalar_select %p105_p7, %s616_s14, %s107_s21  }
   0xd   : > { %p162_p10 = pnand %p469_p6, %p161_p9 }
   0xe   : > { %p190_p11 = scmp.lt.s32.totalorder (!%p162_p10), %s620_s15, 1  ;;  %v630_v0 = vmov (!%p162_p10), 0.0   ;;  %v207_v1 = vld [vmem:[%s811_s2 + $0x10] sm:$0xff] (!%p162_p10)  ;;  %v631_v2 = vmov (!%p162_p10), 0   ;;  %v205_v3 = vld [vmem:[%s811_s2] sm:$0xff] (!%p162_p10)  ;;  %v208_v4 = vld [vmem:[%s811_s2 + $0x18] sm:$0xff] (!%p162_p10) }
   0xf   : > { %165 = sbr.rel (%p162_p10) target bundleno = 270 (0x10e), region = 32  ;;  %313 = vmatprep.mubr.f32.mxu0 (!%p162_p10), %v630_v0  ;;  %325 = vmatprep.mubr.f32.mxu1 (!%p162_p10), %v630_v0  ;;  %v206_v5 = vld [vmem:[%s811_s2 + $0x8] sm:$0xff] (!%p162_p10)  ;;  %vm244_vm0 = vcmask (!%p162_p10), 1043456   ;;  %v200_v8 = vld [vmem:[%s810_s1] sm:$0xff] (!%p162_p10)  ;;  %vm231_vm1 = vcmask (!%p162_p10), 31744   ;;  %v202_v9 = vld [vmem:[%s810_s1 + $0x10] sm:$0xff] (!%p162_p10) }
  0x10   : > { %548 = vset.pattern.permute.xlu1 (!%p162_p10), %v631_v2  ;;  %547 = vset.pattern.permute.xlu0 (!%p162_p10), %v631_v2  ;;  %v201_v10 = vld [vmem:[%s810_s1 + $0x8] sm:$0xff] (!%p162_p10)  ;;  %v203_v11 = vld [vmem:[%s810_s1 + $0x18] sm:$0xff] (!%p162_p10)  ;;  %s186_s30 = sand.u32 (!%p162_p10), 1, %s612_s13   ;;  %s485_s6 = sshll.u32 (!%p162_p10), %s620_s15, 10 }
  0x11   : > { %221 = vperm.xlu1 (!%p162_p10), %548, %v207_v1   ;;  %211 = vperm.xlu0 (!%p162_p10), %547, %v205_v3   ;;  %s753_s9 = scalar_lea.hbm (!%p162_p10), %s812_s3, %s485_s6  ;;  %s763_s10 = scalar_lea.sflag (!%p162_p10), [#allocation3], %s186_s30 }
  0x12   : > { %s632_s18 = smov (!%p162_p10), [#allocation2]  }
  0x13   : > { %s554_s19 = sshll.u32 (!%p162_p10), %s632_s18, 4  ;;  %s555_s19 = int_to_ptr.vmem [resolvable:$false] %s554_s19 }
  0x14   : > { %s556_s21 = scalar_lea.vmem (!%p162_p10), %s555_s19, 2048 }
  0x15   : > { %226 = vperm.xlu1 (!%p162_p10), %548, %v208_v4   ;;  %216 = vperm.xlu0 (!%p162_p10), %547, %v206_v5  }
  0x16   : > { %s191_s28 = scalar_select %p190_p11, %s620_s15, 1 }
  0x18   : > { %s484_s4 = sshll.u32 %s191_s28, 3 }
  0x19   : > { %s197_s11 = scalar_lea.vmem %s809_s0, %s484_s4  ;;  %s470_s4 = sshll.u32 %s186_s30, 6 }
  0x1a   : > { %v204_v6 = vld [vmem:[%s197_s11] sm:$0xff]  ;;  %s742_s5 = scalar_lea.vmem [#allocation2], %s470_s4 }
  0x1b   : > { %v230_v7 = vcombine.high %v204_v6, %v204_v6  ;;  %s386_s7 = sshll.u32 %s742_s5, 4  ;;  %s755_s7 = int_to_ptr.vmem [resolvable:$true] %s386_s7 }
  0x1c   : > { %s550_s11 = scalar_lea.vmem %s755_s7, 1024  ;;  %p557_p1 = scmp.lt.s32.totalorder %s755_s7, %s555_s19 }
  0x1d   : > { %473 = vmatprep.subr.msk.mxu0 %vm244_vm0, %v230_v7  ;;  %486 = vmatprep.subr.msk.mxu1 %vm244_vm0, %v230_v7  ;;  %p551_p12 = scmp.ne.s32.totalorder %s755_s7, %s550_s11  ;;  %p558_p2 = scmp.lt.s32.totalorder %s556_s21, %s550_s11 }
  0x1e   : > { %474 = vmatpush1.msk.msra.mxu0 %vm244_vm0, %v204_v6  ;;  %487 = vmatpush1.msk.msra.mxu1 %vm244_vm0, %v204_v6 }
  0x1f   : > { %475 = vmatmul.mubr.msk.f32.vlgmr.msra.gmra.mrb[0].mxu0 %vm231_vm1, %v200_v8  ;;  %477 = vmatmul.mubr.msk.f32.vlgmr.msra.gmra.mrb[0].mxu1 %vm231_vm1, %v202_v9  ;;  %p552_p13 = pnand %p551_p12, %p695_p4  ;;  %p559_p3 = por %p558_p2, %p557_p1 }
  0x20   : > { %319 = vmatprep.mubr.f32.mxu0 %v630_v0  ;;  %331 = vmatprep.mubr.f32.mxu1 %v630_v0 }
  0x21   : > { %p553_p0 = pneg %p552_p13 }
  0x23   : > { %476 = vmatmul.mubr.msk.f32.gmra.mrb[2].mxu0 %vm231_vm1, %v201_v10  ;;  %478 = vmatmul.mubr.msk.f32.gmra.mrb[2].mxu1 %vm231_vm1, %v203_v11  ;;  %p560_p5 = pnand %p559_p3, %p553_p0 }
  0x90   : > { %v222_v12 = vpop.permute.xlu1 %221  ;;  %v212_v13 = vpop.permute.xlu0 %211 }
  0x94   : > { %v227_v24 = vpop.permute.xlu1 %226  ;;  %v217_v25 = vpop.permute.xlu0 %216 }
  0xf2   : > { %v315_v14 = vpop.f32.mrb[0].mxu0  ;;  %v327_v15 = vpop.f32.mrb[0].mxu1 }
  0xf3   : > { %v316_v16 = vadd.f32 %v315_v14, %v212_v13  ;;  %v328_v17 = vadd.f32 %v327_v15, %v222_v12  ;;  %v317_v18 = vpop.f32.mrb[1].mxu0  ;;  %v329_v19 = vpop.f32.mrb[1].mxu1 }
  0xf4   : > { %v318_v20 = vadd.f32 %v317_v18, %v212_v13  ;;  %v330_v21 = vadd.f32 %v329_v19, %v222_v12 }
  0xf5   : > { %vm338_vm2 = vcmp.ge.f32.partialorder %v316_v16, 0.0  ;;  %v346_v22 = vmul.f32 0.2, %v316_v16  ;;  %vm342_vm3 = vcmp.ge.f32.partialorder %v328_v17, 0.0  ;;  %v350_v23 = vmul.f32 0.2, %v328_v17 }
  0xf6   : > { %vm339_vm4 = vcmp.ge.f32.partialorder %v318_v20, 0.0  ;;  %v347_v26 = vmul.f32 0.2, %v318_v20  ;;  %vm343_vm5 = vcmp.ge.f32.partialorder %v330_v21, 0.0  ;;  %v351_v27 = vmul.f32 0.2, %v330_v21 }
  0xf7   : > { %v354_v28 = vsel %vm338_vm2, %v316_v16, %v346_v22  ;;  %v358_v29 = vsel %vm342_vm3, %v328_v17, %v350_v23  ;;  %v321_v30 = vpop.f32.mrb[2].mxu0  ;;  %v333_v31 = vpop.f32.mrb[2].mxu1 }
  0xf8   : > { %362 = vst [vmem:[%s742_s5] sm:$0xff] %v354_v28  ;;  %366 = vst [vmem:[%s742_s5 + $0x20] sm:$0xff] %v358_v29  ;;  %v355_v32 = vsel %vm339_vm4, %v318_v20, %v347_v26  ;;  %v359_v33 = vsel %vm343_vm5, %v330_v21, %v351_v27  ;;  %v322_v34 = vadd.f32 %v321_v30, %v217_v25  ;;  %v323_v36 = vpop.f32.mrb[3].mxu0  ;;  %v335_v37 = vpop.f32.mrb[3].mxu1 }
  0xf9   : > { %v334_v35 = vadd.f32 %v333_v31, %v227_v24  ;;  %363 = vst [vmem:[%s742_s5 + $0x8] sm:$0xff] %v355_v32  ;;  %367 = vst [vmem:[%s742_s5 + $0x28] sm:$0xff] %v359_v33  ;;  %v324_v38 = vadd.f32 %v323_v36, %v217_v25  ;;  %v336_v39 = vadd.f32 %v335_v37, %v227_v24 }
  0xfa   : > { %vm340_vm6 = vcmp.ge.f32.partialorder %v322_v34, 0.0  ;;  %v348_v40 = vmul.f32 0.2, %v322_v34 }
  0xfb   : > { %vm344_vm7 = vcmp.ge.f32.partialorder %v334_v35, 0.0  ;;  %v352_v41 = vmul.f32 0.2, %v334_v35  ;;  %vm341_vm8 = vcmp.ge.f32.partialorder %v324_v38, 0.0  ;;  %v349_v42 = vmul.f32 0.2, %v324_v38 }
  0xfc   : > { %vm345_vm9 = vcmp.ge.f32.partialorder %v336_v39, 0.0  ;;  %v353_v43 = vmul.f32 0.2, %v336_v39  ;;  %v356_v44 = vsel %vm340_vm6, %v322_v34, %v348_v40 }
  0xfd   : > { %v360_v45 = vsel %vm344_vm7, %v334_v35, %v352_v41  ;;  %364 = vst [vmem:[%s742_s5 + $0x10] sm:$0xff] %v356_v44  ;;  %v357_v46 = vsel %vm341_vm8, %v324_v38, %v349_v42 }
  0xfe   : > { %368 = vst [vmem:[%s742_s5 + $0x30] sm:$0xff] %v360_v45  ;;  %v361_v47 = vsel %vm345_vm9, %v336_v39, %v353_v43  ;;  %365 = vst [vmem:[%s742_s5 + $0x18] sm:$0xff] %v357_v46 }
  0xff   : > { %369 = vst [vmem:[%s742_s5 + $0x38] sm:$0xff] %v361_v47 }
 0x100   : > { %563 = shalt.err (!%p560_p5)
}
 0x101   : > { %s564_s23 = scalar_lea.hbm %s753_s9, 1024  ;;  %s568_s28 = scalar_lea.hbm %s812_s3, 2048 }
 0x102   : > { %p565_p6 = scmp.ne.s32.totalorder %s753_s9, %s564_s23  ;;  %p569_p10 = scmp.lt.u32.totalorder %s753_s9, %s812_s3 }
 0x103   : > { %p570_p11 = scmp.lt.u32.totalorder %s568_s28, %s564_s23  ;;  %p572_p13 = scmp.lt.u32.totalorder %s564_s23, %s753_s9 }
 0x104   : > { %p566_p7 = pnand %p565_p6, %p695_p4 }
 0x105   : > { %p571_p12 = por %p570_p11, %p569_p10 }
 0x106   : > { %p567_p9 = pneg %p566_p7 }
 0x107   : > { %p573_p0 = por %p572_p13, %p571_p12 }
 0x109   : > { %p574_p1 = pnand %p573_p0, %p567_p9 }
 0x10b   : > { %577 = shalt.err (!%p574_p1)
}
 0x10c   : > { %s633_s4 = smov 256   ;;  %s634_s5 = smov 16  }
 0x10d   : > { %488 = dma.vmem_to_hbm [thread:$0]  (%p695_p4), %s755_s7, 1024, %s753_s9, %s763_s10, %s633_s4, %s633_s4, %s634_s5  }
 0x10e PF: > { %p494_p2 = scmp.ge.s32.totalorder %s628_s17, 2  ;;  %s401_s6 = sand.u32 1, %s608_s12  }
 0x10f   : > { %s402_s15 = scalar_lea.sflag [#allocation3], %s401_s6 }
 0x110   : > { %p491_p3 = pnand %p494_p2, %p702_p8 }
 0x112   : > { %603 = dma.done.wait (!%p491_p3), %s402_s15, 1024  }
 0x113   : > { %605 = vsyncadd (!%p491_p3), %s402_s15, 4294966272  ;;  %s16_s17 = sadd.s32 1, %s628_s17   ;;  %s815_s12 = smov %s612_s13 }
 0x114   : > { %p13_p5 = scmp.ge.s32.totalorder %s16_s17, 4   ;;  %s816_s13 = smov %s616_s14 }
 0x115   : > { %s817_s14 = smov %s708_s25  ;;  %s818_s15 = smov %s624_s16 }
 0x116   : > { %s819_s16 = smov %s821_s20  ;;  %15 = sbr.rel (!%p13_p5) target bundleno = 4 (0x4), region = 67 }
 0x11d   :  { %407 = vsyncpa [#allocation3], 1 }
 0x11e   :  { %409 = vsyncpa [#allocation3 + $0x1], 1 }

</bundles_post_ra>
